<compile_context>
chip_gen: v7x
topology: tpu7x:2x2x1
jax: 0.10.0
libtpu: 0.0.40
codegen_flags: <defaults>
</compile_context>

<pallas_src>
import jax
import jax.numpy as jnp
from jax import lax
from jax.experimental import pallas as pl
from jax.experimental.pallas import tpu as pltpu


# --------------------------------------------------------------------------
# hardware queries (defensive: fall back to conservative values)
# --------------------------------------------------------------------------
def _vmem_capacity_bytes() -> int:
    """Physical VMEM capacity (falls back to the v7x worst case)."""
    try:
        return int(pltpu.get_tpu_info().vmem_capacity_bytes)
    except Exception:
        return 64 * 1024 * 1024


def _num_tensorcores() -> int:
    """Number of TensorCores per chip (1 on v5e/v6e, 2 on v7x). Fallback 1."""
    try:
        info = pltpu.get_tpu_info()
        for attr in ("num_cores", "core_count", "num_tensorcores",
                     "tensorcore_count"):
            v = getattr(info, attr, None)
            if isinstance(v, int) and v > 0:
                return v
    except Exception:
        pass
    try:
        v = getattr(jax.devices()[0], "num_cores", None)
        if isinstance(v, int) and v > 0:
            return v
    except Exception:
        pass
    return 1


# --------------------------------------------------------------------------
# channel attention from pooled means (in-kernel helper, fused path)
# --------------------------------------------------------------------------
def _attn_from_pooled(pooled, wmask, k: int):
    """pooled: (R, 1) f32 row means; wmask: (k, R, 1) f32 per-row masked taps
    (zero where a tap would cross a batch/channel boundary -> zero padding).
    Returns sigmoid(conv1d_over_channels(pooled)), shape (R, 1), f32."""
    R = pooled.shape[0]
    half = (k - 1) // 2
    conv = jnp.zeros_like(pooled)
    for j in range(k):                      # k tiny & static -> unrolled
        # want shifted[r] = pooled[r + (j - half)]; wrap-around is zeroed by wmask
        shift = (half - j) % R
        shifted = pooled if shift == 0 else pltpu.roll(pooled, shift=shift, axis=0)
        conv = conv + wmask[j] * shifted    # VPU MAC, (R, 1)
    return 1.0 / (1.0 + jnp.exp(-conv))     # sigmoid (exp -> EUP)


# --------------------------------------------------------------------------
# fused single-pass kernel: x resident in a single-buffered VMEM scratch
# --------------------------------------------------------------------------
def _make_fused_kernel(k: int, inv_s: float, R: int, S: int, chunk: int):
    n_main = S // chunk
    rem = S - n_main * chunk

    def kernel(wmask_ref, x_hbm, o_hbm, xbuf, sem):
        # 1) HBM -> VMEM, single buffer
        cp_in = pltpu.make_async_copy(x_hbm, xbuf, sem)
        cp_in.start()
        cp_in.wait()

        # 2) pooled sums with f32 accumulation, chunked (bounded temporaries)
        acc0 = jnp.zeros((R, 1), jnp.float32)
        if n_main:
            def pool_body(i, acc):
                off = pl.multiple_of(i * chunk, chunk)
                c = xbuf[:, pl.ds(off, chunk)].astype(jnp.float32)
                return acc + jnp.sum(c, axis=-1, keepdims=True)
            acc0 = lax.fori_loop(0, n_main, pool_body, acc0)
        if rem:
            tail = xbuf[:, n_main * chunk:].astype(jnp.float32)
            acc0 = acc0 + jnp.sum(tail, axis=-1, keepdims=True)
        pooled = acc0 * inv_s

        # 3) channel conv (k shifted masked MACs) + sigmoid; cast down ONCE
        attn = _attn_from_pooled(pooled, wmask_ref[...], k).astype(xbuf.dtype)

        # 4) scale in place, native dtype, chunk by chunk
        if n_main:
            def scale_body(i, carry):
                off = pl.multiple_of(i * chunk, chunk)
                xbuf[:, pl.ds(off, chunk)] = xbuf[:, pl.ds(off, chunk)] * attn
                return carry
            lax.fori_loop(0, n_main, scale_body, 0)
        if rem:
            xbuf[:, n_main * chunk:] = xbuf[:, n_main * chunk:] * attn

        # 5) VMEM -> HBM
        cp_out = pltpu.make_async_copy(xbuf, o_hbm, sem)
        cp_out.start()
        cp_out.wait()

    return kernel


# --------------------------------------------------------------------------
# streaming path kernels
# --------------------------------------------------------------------------
def _make_pool_kernel(ts: int, ns_pp: int, n_tiles: int, total_s: int):
    """Partial spatial sums accumulated directly into the resident (1,R,1)
    output block.  Only the last logical tile is masked (under pl.when); the
    common path is a plain cast+reduce+add, keeping the pass DMA-bound."""

    def kernel(x_ref, part_ref):
        s = pl.program_id(1)
        t = pl.program_id(0) * ns_pp + s     # logical spatial tile index

        @pl.when(s == 0)
        def _init():
            part_ref[...] = jnp.zeros(part_ref.shape, jnp.float32)

        @pl.when(t < n_tiles - 1)
        def _full():
            part_ref[0, :, :] += jnp.sum(
                x_ref[...].astype(jnp.float32), axis=-1, keepdims=True)

        @pl.when(t == n_tiles - 1)
        def _edge():
            # last (possibly partial / padded) tile; clamped overflow tiles
            # (t > n_tiles - 1) fall through both branches -> contribute 0.
            lane = lax.broadcasted_iota(jnp.int32, x_ref.shape, 1)
            valid = (t * ts + lane) < total_s
            xt = jnp.where(valid, x_ref[...].astype(jnp.float32), 0.0)
            part_ref[0, :, :] += jnp.sum(xt, axis=-1, keepdims=True)

    return kernel


def _scale_kernel(attn_ref, x_ref, o_ref):
    """Pure streaming multiply in native dtype; attn resident."""
    o_ref[...] = x_ref[...] * attn_ref[...]


# --------------------------------------------------------------------------
# wrapper
# --------------------------------------------------------------------------
def eca3d_forward(x5d: jax.Array, conv_w: jax.Array, *,
                  spatial_tile=None, force_two_pass: bool = False) -> jax.Array:
    """x5d: (B, C, D, H, W); conv_w: (k,) Conv1d(1, 1, k, bias=False) weight."""
    B, C, D, H, W = x5d.shape
    R = B * C
    S = D * H * W
    k = int(conv_w.shape[0])
    half = (k - 1) // 2
    inv_s = 1.0 / float(S)

    x = x5d.reshape(R, S)                      # rows = b*C + c, lanes = spatial
    itemsize = jnp.dtype(x.dtype).itemsize
    x_bytes = R * S * itemsize

    vmem_cap = _vmem_capacity_bytes()
    vmem_limit = int(min(vmem_cap * 3 // 4, 100 * 1024 * 1024))

    def cparams(sem):
        return pltpu.CompilerParams(dimension_semantics=sem,
                                    vmem_limit_bytes=vmem_limit)

    # ------------------ fused single-pass path (x resident in VMEM) --------
    # chunk sized so f32 chunk temporaries stay ~<= 4 MiB
    chunk = (4 * 1024 * 1024) // (4 * max(R, 1))
    chunk = max(128, min(65536, (chunk // 128) * 128))
    fused_overhead = 3 * R * min(chunk, S) * 4 + 4096
    if (not force_two_pass) and (x_bytes + fused_overhead <= (vmem_limit * 3) // 4):
        # per-row masked conv taps: wmask[j, r] = w[j] if 0 <= (r%C)+(j-half) < C
        ch = jnp.arange(R, dtype=jnp.int32) % C
        pos = ch[None, :] + (jnp.arange(k, dtype=jnp.int32) - half)[:, None]
        wmask = jnp.where((pos >= 0) & (pos < C),
                          conv_w.astype(jnp.float32)[:, None], 0.0)[:, :, None]
        out = pl.pallas_call(
            _make_fused_kernel(k, inv_s, R, S, chunk),
            out_shape=jax.ShapeDtypeStruct((R, S), x.dtype),
            grid_spec=pltpu.PrefetchScalarGridSpec(
                num_scalar_prefetch=0,
                grid=(1,),
                in_specs=[pl.BlockSpec((k, R, 1), lambda i: (0, 0, 0)),
                          pl.BlockSpec(memory_space=pl.ANY)],
                out_specs=pl.BlockSpec(memory_space=pl.ANY),
                scratch_shapes=[pltpu.VMEM((R, S), x.dtype),
                                pltpu.SemaphoreType.DMA]),
            compiler_params=cparams(("arbitrary",)),
        )(wmask, x)
        return out.reshape(B, C, D, H, W)

    # ------------------ streaming 2-call path -------------------------------
    # per-pass tile sizing against the granted vmem_limit
    budget = (vmem_limit * 3) // 5
    if spatial_tile is None:
        ts1 = budget // (R * (2 * itemsize + 5))   # in dbl-buf + f32 cast temp
        ts3 = budget // (R * (4 * itemsize + 2))   # in + out double buffers
        ts1 = max(128, min(131072, (ts1 // 128) * 128))
        ts3 = max(128, min(131072, (ts3 // 128) * 128))
    else:
        ts1 = ts3 = int(spatial_tile)
    ts1 = min(ts1, S)
    ts3 = min(ts3, S)

    n_tiles = pl.cdiv(S, ts1)
    P = max(1, min(_num_tensorcores(), 2, n_tiles))   # megacore split (v7x)
    ns_pp = pl.cdiv(n_tiles, P)

    # pass 1: partial spatial sums, accumulated into resident (1,R,1) blocks
    partials = pl.pallas_call(
        _make_pool_kernel(ts1, ns_pp, n_tiles, S),
        out_shape=jax.ShapeDtypeStruct((P, R, 1), jnp.float32),
        grid_spec=pltpu.PrefetchScalarGridSpec(
            num_scalar_prefetch=0,
            grid=(P, ns_pp),
            in_specs=[pl.BlockSpec(
                (R, ts1),
                lambda p, s: (0, jnp.minimum(p * ns_pp + s, n_tiles - 1)))],
            out_specs=pl.BlockSpec((1, R, 1), lambda p, s: (p, 0, 0))),
        compiler_params=cparams(("parallel", "arbitrary")),
    )(x)

    # tiny combine + channel conv + sigmoid folded into plain JAX (O(kC) work)
    pooled = jnp.sum(partials, axis=0)[:, 0] * inv_s            # (R,)
    y = pooled.reshape(B, C)
    ypad = jnp.pad(y, ((0, 0), (half, half)))
    conv = sum(conv_w[j].astype(jnp.float32) * ypad[:, j:j + C] for j in range(k))
    attn = jax.nn.sigmoid(conv).reshape(R, 1).astype(x.dtype)   # cast down once

    # pass 2: pure streaming x * attn (attn resident, big lane-dense tiles)
    n_tiles3 = pl.cdiv(S, ts3)
    out = pl.pallas_call(
        _scale_kernel,
        out_shape=jax.ShapeDtypeStruct((R, S), x.dtype),
        grid_spec=pltpu.PrefetchScalarGridSpec(
            num_scalar_prefetch=0,
            grid=(n_tiles3,),
            in_specs=[pl.BlockSpec((R, 1), lambda s: (0, 0)),
                      pl.BlockSpec((R, ts3), lambda s: (0, s))],
            out_specs=pl.BlockSpec((R, ts3), lambda s: (0, s))),
        compiler_params=cparams(("parallel",)),
    )(attn, x)

    return out.reshape(B, C, D, H, W)


# --------------------------------------------------------------------------
# pure-JAX reference (for correctness check)
# --------------------------------------------------------------------------
def eca3d_ref(x5d, conv_w):
    k = conv_w.shape[0]
    half = (k - 1) // 2
    y = x5d.mean(axis=(2, 3, 4))                                  # (B, C)
    ypad = jnp.pad(y, ((0, 0), (half, half)))
    conv = sum(conv_w[i] * ypad[:, i:i + y.shape[1]] for i in range(k))
    attn = jax.nn.sigmoid(conv)
    return x5d * attn[:, :, None, None, None]


if __name__ == "__main__":
    key = jax.random.PRNGKey(0)
    kx, kw = jax.random.split(key)

    B, C, D, H, W = 2, 4, 16, 16, 16
    k_size = 3

    x = jax.random.normal(kx, (B, C, D, H, W), dtype=jnp.float32)
    # Conv1d(1, 1, k, bias=False) weight -> (k,); kaiming-uniform-like init
    bound = 1.0 / jnp.sqrt(float(k_size))
    conv_w = jax.random.uniform(kw, (k_size,), dtype=jnp.float32,
                                minval=-bound, maxval=bound)

    ref = eca3d_ref(x, conv_w)

    # auto path (fused single pallas_call for this small shape)
    out = jax.block_until_ready(eca3d_forward(x, conv_w))
    assert out.shape == (B, C, D, H, W)
    assert jnp.allclose(out, ref, atol=1e-5, rtol=1e-5), "fused path mismatch"

    # streaming path: even tiling (512) and odd/partial tiling (640, S % ts != 0)
    for ts in (512, 640):
        out2 = jax.block_until_ready(
            eca3d_forward(x, conv_w, force_two_pass=True, spatial_tile=ts))
        assert jnp.allclose(out2, ref, atol=1e-5, rtol=1e-5), f"streaming mismatch ts={ts}"

    print("KERNEL_OK")
</pallas_src>

<mosaic_0001>
module attributes {stable_mosaic.version = 11 : i64} {
  func.func @kernel(%arg0: i32, %arg1: memref<3x8x1xf32, #tpu.memory_space<vmem>>, %arg2: memref<8x4096xf32, #tpu.memory_space<any>>, %arg3: memref<8x4096xf32, #tpu.memory_space<any>>, %arg4: memref<8x4096xf32, #tpu.memory_space<vmem>>, %arg5: memref<!tpu.dma_semaphore, #tpu.memory_space<semaphore_mem>>) attributes {dimension_semantics = [#tpu.dimension_semantics<arbitrary>], iteration_bounds = array<i64: 1>, scalar_prefetch = 0 : i64, scratch_operands = 2 : i64, tpu.core_type = #tpu.core_type<tc>, window_params = [{pipeline_mode = #tpu.pipeline_mode<synchronous>, transform_indices = @transform_0, window_bounds = array<i64: 3, 8, 1>}, {}, {}]} {
    tpu.enqueue_dma source(%arg2 : memref<8x4096xf32, #tpu.memory_space<any>>) target(%arg4 : memref<8x4096xf32, #tpu.memory_space<vmem>>) target_semaphore(%arg5 : memref<!tpu.dma_semaphore, #tpu.memory_space<semaphore_mem>>)
    tpu.wait_dma2 semaphore(%arg5 : memref<!tpu.dma_semaphore, #tpu.memory_space<semaphore_mem>>) src(%arg2 : memref<8x4096xf32, #tpu.memory_space<any>>) dst(%arg4 : memref<8x4096xf32, #tpu.memory_space<vmem>>)
    %cst = arith.constant 0.000000e+00 : f32
    %0 = vector.broadcast %cst : f32 to vector<8x1xf32>
    %c0 = arith.constant 0 : index
    %c0_0 = arith.constant 0 : index
    %1 = vector.load %arg4[%c0, %c0_0] : memref<8x4096xf32, #tpu.memory_space<vmem>>, vector<8x4096xf32>
    %cst_1 = arith.constant dense<0.000000e+00> : vector<8xf32>
    %2 = vector.multi_reduction <add>, %1, %cst_1 [1] : vector<8x4096xf32> to vector<8xf32>
    %3 = vector.shape_cast %2 : vector<8xf32> to vector<8x1xf32>
    %4 = arith.addf %0, %3 : vector<8x1xf32>
    %cst_2 = arith.constant 2.44140625E-4 : f32
    %5 = vector.broadcast %cst_2 : f32 to vector<8x1xf32>
    %6 = arith.mulf %4, %5 : vector<8x1xf32>
    %c0_3 = arith.constant 0 : index
    %c0_4 = arith.constant 0 : index
    %c0_5 = arith.constant 0 : index
    %7 = vector.load %arg1[%c0_3, %c0_4, %c0_5] : memref<3x8x1xf32, #tpu.memory_space<vmem>>, vector<3x8x1xf32>
    %cst_6 = arith.constant 0.000000e+00 : f32
    %8 = vector.broadcast %cst_6 : f32 to vector<8x1xf32>
    %c1_i32 = arith.constant 1 : i32
    %9 = tpu.dynamic_rotate %6 by %c1_i32 dim 0 : vector<8x1xf32>, i32 -> vector<8x1xf32>
    %10 = vector.extract_strided_slice %7 {offsets = [0, 0, 0], sizes = [1, 8, 1], strides = [1, 1, 1]} : vector<3x8x1xf32> to vector<1x8x1xf32>
    %11 = vector.shape_cast %10 : vector<1x8x1xf32> to vector<8x1xf32>
    %12 = arith.mulf %11, %9 : vector<8x1xf32>
    %13 = arith.addf %8, %12 : vector<8x1xf32>
    %14 = vector.extract_strided_slice %7 {offsets = [1, 0, 0], sizes = [1, 8, 1], strides = [1, 1, 1]} : vector<3x8x1xf32> to vector<1x8x1xf32>
    %15 = vector.shape_cast %14 : vector<1x8x1xf32> to vector<8x1xf32>
    %16 = arith.mulf %15, %6 : vector<8x1xf32>
    %17 = arith.addf %13, %16 : vector<8x1xf32>
    %c7_i32 = arith.constant 7 : i32
    %18 = tpu.dynamic_rotate %6 by %c7_i32 dim 0 : vector<8x1xf32>, i32 -> vector<8x1xf32>
    %19 = vector.extract_strided_slice %7 {offsets = [2, 0, 0], sizes = [1, 8, 1], strides = [1, 1, 1]} : vector<3x8x1xf32> to vector<1x8x1xf32>
    %20 = vector.shape_cast %19 : vector<1x8x1xf32> to vector<8x1xf32>
    %21 = arith.mulf %20, %18 : vector<8x1xf32>
    %22 = arith.addf %17, %21 : vector<8x1xf32>
    %cst_7 = arith.constant 0.000000e+00 : f32
    %23 = vector.broadcast %cst_7 : f32 to vector<8x1xf32>
    %24 = arith.subf %23, %22 : vector<8x1xf32>
    %25 = math.exp %24 : vector<8x1xf32>
    %cst_8 = arith.constant 1.000000e+00 : f32
    %26 = vector.broadcast %cst_8 : f32 to vector<8x1xf32>
    %27 = arith.addf %26, %25 : vector<8x1xf32>
    %cst_9 = arith.constant 1.000000e+00 : f32
    %28 = vector.broadcast %cst_9 : f32 to vector<8x1xf32>
    %29 = arith.divf %28, %27 : vector<8x1xf32>
    %c0_10 = arith.constant 0 : index
    %c0_11 = arith.constant 0 : index
    %30 = vector.load %arg4[%c0_10, %c0_11] : memref<8x4096xf32, #tpu.memory_space<vmem>>, vector<8x4096xf32>
    %31 = vector.broadcast %29 : vector<8x1xf32> to vector<8x4096xf32>
    %32 = arith.mulf %30, %31 : vector<8x4096xf32>
    %c0_12 = arith.constant 0 : index
    %c0_13 = arith.constant 0 : index
    %33 = vector.load %arg4[%c0_12, %c0_13] : memref<8x4096xf32, #tpu.memory_space<vmem>>, vector<8x4096xf32>
    tpu.vector_store %arg4[%c0_12, %c0_13], %32 {strides = array<i32>} : memref<8x4096xf32, #tpu.memory_space<vmem>>, vector<8x4096xf32>,
    tpu.enqueue_dma source(%arg4 : memref<8x4096xf32, #tpu.memory_space<vmem>>) target(%arg3 : memref<8x4096xf32, #tpu.memory_space<any>>) target_semaphore(%arg5 : memref<!tpu.dma_semaphore, #tpu.memory_space<semaphore_mem>>)
    tpu.wait_dma2 semaphore(%arg5 : memref<!tpu.dma_semaphore, #tpu.memory_space<semaphore_mem>>) src(%arg4 : memref<8x4096xf32, #tpu.memory_space<vmem>>) dst(%arg3 : memref<8x4096xf32, #tpu.memory_space<any>>)
    return
  }
  func.func @transform_0(%arg0: i32) -> (i32, i32, i32) {
    %c0_i32 = arith.constant 0 : i32
    %c0_i32_0 = arith.constant 0 : i32
    %c0_i32_1 = arith.constant 0 : i32
    %c0_i32_2 = arith.constant 0 : i32
    return %c0_i32, %c0_i32_0, %c0_i32_1 : i32, i32, i32
  }
}

</mosaic_0001>

<bundles_post_ra>
// kernel: tpu_custom_call.1
= control target key start
LH: loop header
LB: loop body
LE: loop exit
PB: predicated region body
PF: predicated region fallthrough
CT: control target
= control target key end

     0   :  { %s252_s9 = smov [#allocation2]   ;;  %s446_s0 = inlined_call_operand.vmem [shape: f32[3,8,1], index: 0, kind: input, shape index: {}]   ;;  %s447_s1 = inlined_call_operand.hbm [shape: f32[8,4096], index: 1, kind: input, shape index: {}]   ;;  %s448_s2 = inlined_call_operand.hbm [shape: f32[8,4096], index: 2, kind: output, shape index: {}]  }
   0x1   :  { %s16_s10 = sshll.u32 %s252_s9, 4  ;;  %s204_s13 = scalar_lea.hbm %s447_s1, 4096  ;;  %s269_s10 = int_to_ptr.vmem [resolvable:$true] %s16_s10 }
   0x2   :  { %p205_p0 = scmp.ne.s32.totalorder %s447_s1, %s204_s13  ;;  %p208_p1 = scmp.lt.u32.totalorder %s204_s13, %s447_s1 }
   0x4   :  { %p210_p2 = pnand %p208_p1, %p205_p0 }
   0x6   :  { %213 = shalt.err (!%p210_p2)  }
   0x7   :  { %s214_s18 = scalar_lea.vmem %s269_s10, 4096  ;;  %p219_p4 = scmp.lt.s32.totalorder %s269_s10, %s269_s10 }
   0x8   :  { %p215_p3 = scmp.ne.s32.totalorder %s269_s10, %s214_s18  ;;  %p220_p5 = scmp.lt.s32.totalorder %s214_s18, %s214_s18 }
   0xa   :  { %p221_p6 = por %p220_p5, %p219_p4 }
   0xc   :  { %p284_p7 = pnand %p221_p6, %p215_p3 }
   0xe   :  { %225 = shalt.err (!%p284_p7)  }
   0xf   :  { %19 = dma.hbm_to_vmem [thread:$0]  %s447_s1, 4096, %s269_s10, [#allocation3] }
  0x10   :  { %248 = dma.done.wait [#allocation3], 4096 }
  0x11   :  { %249 = vsyncadd [#allocation3], 4294963200  ;;  %v294_v0 = vld [vmem:[#allocation2] sm:$0xff]  ;;  %v296_v1 = vld [vmem:[#allocation2 + $0x8] sm:$0xff]  ;;  %v253_v63 = vmov 0  }
  0x12   :  { %v298_v2 = vld [vmem:[#allocation2 + $0x10] sm:$0xff]  ;;  %v56_v3 = vadd.f32 %v296_v1, %v294_v0  ;;  %v302_v4 = vld [vmem:[#allocation2 + $0x18] sm:$0xff]  ;;  %v305_v6 = vld [vmem:[#allocation2 + $0x20] sm:$0xff]  ;;  %199 = vset.pattern.permute.xlu0 %v253_v63 }
  0x13   :  { %v308_v8 = vld [vmem:[#allocation2 + $0x28] sm:$0xff]  ;;  %v311_v10 = vld [vmem:[#allocation2 + $0x30] sm:$0xff]  ;;  %v314_v12 = vld [vmem:[#allocation2 + $0x38] sm:$0xff] }
  0x14   :  { %v57_v5 = vadd.f32 %v56_v3, %v298_v2  ;;  %v317_v14 = vld [vmem:[#allocation2 + $0x40] sm:$0xff]  ;;  %v320_v16 = vld [vmem:[#allocation2 + $0x48] sm:$0xff]  ;;  %v323_v18 = vld [vmem:[#allocation2 + $0x50] sm:$0xff] }
  0x15   :  { %v326_v20 = vld [vmem:[#allocation2 + $0x58] sm:$0xff]  ;;  %v329_v22 = vld [vmem:[#allocation2 + $0x60] sm:$0xff]  ;;  %v332_v24 = vld [vmem:[#allocation2 + $0x68] sm:$0xff] }
  0x16   :  { %v58_v7 = vadd.f32 %v57_v5, %v302_v4  ;;  %v335_v26 = vld [vmem:[#allocation2 + $0x70] sm:$0xff]  ;;  %v338_v28 = vld [vmem:[#allocation2 + $0x78] sm:$0xff]  ;;  %v341_v30 = vld [vmem:[#allocation2 + $0x80] sm:$0xff] }
  0x17   :  { %v344_v32 = vld [vmem:[#allocation2 + $0x88] sm:$0xff]  ;;  %v347_v34 = vld [vmem:[#allocation2 + $0x90] sm:$0xff]  ;;  %v350_v36 = vld [vmem:[#allocation2 + $0x98] sm:$0xff] }
  0x18   :  { %v59_v9 = vadd.f32 %v58_v7, %v305_v6  ;;  %v353_v38 = vld [vmem:[#allocation2 + $0xa0] sm:$0xff]  ;;  %v356_v40 = vld [vmem:[#allocation2 + $0xa8] sm:$0xff]  ;;  %v359_v42 = vld [vmem:[#allocation2 + $0xb0] sm:$0xff] }
  0x19   :  { %v362_v44 = vld [vmem:[#allocation2 + $0xb8] sm:$0xff]  ;;  %v365_v46 = vld [vmem:[#allocation2 + $0xc0] sm:$0xff]  ;;  %v368_v48 = vld [vmem:[#allocation2 + $0xc8] sm:$0xff] }
  0x1a   :  { %v60_v11 = vadd.f32 %v59_v9, %v308_v8  ;;  %v371_v50 = vld [vmem:[#allocation2 + $0xd0] sm:$0xff]  ;;  %v374_v52 = vld [vmem:[#allocation2 + $0xd8] sm:$0xff]  ;;  %v377_v54 = vld [vmem:[#allocation2 + $0xe0] sm:$0xff] }
  0x1b   :  { %v380_v56 = vld [vmem:[#allocation2 + $0xe8] sm:$0xff]  ;;  %v383_v58 = vld [vmem:[#allocation2 + $0xf0] sm:$0xff]  ;;  %v386_v60 = vld [vmem:[#allocation2 + $0xf8] sm:$0xff] }
  0x1c   :  { %v61_v13 = vadd.f32 %v60_v11, %v311_v10  ;;  %v91_v7 = vld [vmem:[%s446_s0] sm:$0xff]  ;;  %v92_v9 = vld [vmem:[%s446_s0 + $0x8] sm:$0xff] }
  0x1e   :  { %v62_v15 = vadd.f32 %v61_v13, %v314_v12 }
  0x20   :  { %v63_v17 = vadd.f32 %v62_v15, %v317_v14  ;;  %v93_v15 = vld [vmem:[%s446_s0 + $0x10] sm:$0xff] }
  0x22   :  { %v64_v19 = vadd.f32 %v63_v17, %v320_v16 }
  0x24   :  { %v65_v21 = vadd.f32 %v64_v19, %v323_v18 }
  0x26   :  { %v66_v23 = vadd.f32 %v65_v21, %v326_v20 }
  0x28   :  { %v67_v25 = vadd.f32 %v66_v23, %v329_v22 }
  0x2a   :  { %v68_v27 = vadd.f32 %v67_v25, %v332_v24 }
  0x2c   :  { %v69_v29 = vadd.f32 %v68_v27, %v335_v26 }
  0x2e   :  { %v70_v31 = vadd.f32 %v69_v29, %v338_v28 }
  0x30   :  { %v71_v33 = vadd.f32 %v70_v31, %v341_v30 }
  0x32   :  { %v72_v35 = vadd.f32 %v71_v33, %v344_v32 }
  0x34   :  { %v73_v37 = vadd.f32 %v72_v35, %v347_v34 }
  0x36   :  { %v74_v39 = vadd.f32 %v73_v37, %v350_v36 }
  0x38   :  { %v75_v41 = vadd.f32 %v74_v39, %v353_v38 }
  0x3a   :  { %v76_v43 = vadd.f32 %v75_v41, %v356_v40 }
  0x3c   :  { %v77_v45 = vadd.f32 %v76_v43, %v359_v42 }
  0x3e   :  { %v78_v47 = vadd.f32 %v77_v45, %v362_v44 }
  0x40   :  { %v79_v49 = vadd.f32 %v78_v47, %v365_v46 }
  0x42   :  { %v80_v51 = vadd.f32 %v79_v49, %v368_v48 }
  0x44   :  { %v81_v53 = vadd.f32 %v80_v51, %v371_v50 }
  0x46   :  { %v82_v55 = vadd.f32 %v81_v53, %v374_v52 }
  0x48   :  { %v83_v57 = vadd.f32 %v82_v55, %v377_v54 }
  0x4a   :  { %v84_v59 = vadd.f32 %v83_v57, %v380_v56 }
  0x4c   :  { %v85_v61 = vadd.f32 %v84_v59, %v383_v58 }
  0x4e   :  { %v86_v62 = vadd.f32 %v85_v61, %v386_v60 }
  0x50   :  { %87 = vadd.xlane.f32.xlu0 %v86_v62 }
  0xdd   :  { %v88_v3 = vpop.xlane.xlu0 %87 }
  0xde   :  { %v90_v5 = vmul.f32 0.00024414063, %v88_v3 }
  0xe0   :  { %v94_v11 = vrot.slane %v90_v5, 7  ;;  %v99_v13 = vrot.slane %v90_v5, 1  ;;  %v97_v19 = vmul.f32 %v92_v9, %v90_v5 }
  0xe2   :  { %v95_v17 = vmul.f32 %v94_v11, %v91_v7  ;;  %v100_v23 = vmul.f32 %v99_v13, %v93_v15 }
  0xe4   :  { %v98_v21 = vadd.f32 %v97_v19, %v95_v17 }
  0xe6   :  { %v101_v25 = vadd.f32 %v100_v23, %v98_v21 }
  0xe8   :  { %v102_v27 = vsub.f32 0.0, %v101_v25 }
  0xea   :  { %v103_v29 = vmul.f32 1.442695, %v102_v27 }
  0xec   :  { %200 = vpow2.f32 %v103_v29 }
  0xf6   :  { %v201_v31 = vpop.eup %200 }
  0xf7   :  { %v105_v33 = vadd.f32 1.0, %v201_v31 }
  0xf9   :  { %202 = vrcp.f32 %v105_v33 }
 0x103   :  { %v203_v35 = vpop.eup %202 }
 0x104   :  { %110 = vperm.xlu0 %199, %v203_v35  }
 0x183   :  { %v111_v37 = vpop.permute.xlu0 %110 }
 0x184   :  { %v113_v39 = vmul.f32 %v111_v37, %v294_v0  ;;  %v114_v41 = vmul.f32 %v111_v37, %v296_v1  ;;  %v115_v43 = vmul.f32 %v111_v37, %v298_v2  ;;  %v116_v45 = vmul.f32 %v111_v37, %v302_v4 }
 0x185   :  { %v117_v47 = vmul.f32 %v111_v37, %v305_v6  ;;  %v118_v49 = vmul.f32 %v111_v37, %v308_v8  ;;  %v119_v51 = vmul.f32 %v111_v37, %v311_v10  ;;  %v120_v53 = vmul.f32 %v111_v37, %v314_v12 }
 0x186   :  { %v121_v55 = vmul.f32 %v111_v37, %v317_v14  ;;  %v122_v57 = vmul.f32 %v111_v37, %v320_v16  ;;  %v123_v0 = vmul.f32 %v111_v37, %v323_v18  ;;  %v124_v1 = vmul.f32 %v111_v37, %v326_v20  ;;  %145 = vst [vmem:[#allocation2] sm:$0xff] %v113_v39 }
 0x187   :  { %146 = vst [vmem:[#allocation2 + $0x8] sm:$0xff] %v114_v41  ;;  %147 = vst [vmem:[#allocation2 + $0x10] sm:$0xff] %v115_v43  ;;  %v125_v2 = vmul.f32 %v111_v37, %v329_v22  ;;  %v126_v4 = vmul.f32 %v111_v37, %v332_v24  ;;  %v127_v6 = vmul.f32 %v111_v37, %v335_v26 }
 0x188   :  { %148 = vst [vmem:[#allocation2 + $0x18] sm:$0xff] %v116_v45  ;;  %v128_v8 = vmul.f32 %v111_v37, %v338_v28  ;;  %149 = vst [vmem:[#allocation2 + $0x20] sm:$0xff] %v117_v47  ;;  %v129_v10 = vmul.f32 %v111_v37, %v341_v30  ;;  %v130_v12 = vmul.f32 %v111_v37, %v344_v32 }
 0x189   :  { %150 = vst [vmem:[#allocation2 + $0x28] sm:$0xff] %v118_v49  ;;  %151 = vst [vmem:[#allocation2 + $0x30] sm:$0xff] %v119_v51  ;;  %v131_v14 = vmul.f32 %v111_v37, %v347_v34  ;;  %v132_v16 = vmul.f32 %v111_v37, %v350_v36  ;;  %v133_v18 = vmul.f32 %v111_v37, %v353_v38 }
 0x18a   :  { %152 = vst [vmem:[#allocation2 + $0x38] sm:$0xff] %v120_v53  ;;  %153 = vst [vmem:[#allocation2 + $0x40] sm:$0xff] %v121_v55  ;;  %v134_v20 = vmul.f32 %v111_v37, %v356_v40  ;;  %v135_v22 = vmul.f32 %v111_v37, %v359_v42  ;;  %v136_v24 = vmul.f32 %v111_v37, %v362_v44 }
 0x18b   :  { %154 = vst [vmem:[#allocation2 + $0x48] sm:$0xff] %v122_v57  ;;  %155 = vst [vmem:[#allocation2 + $0x50] sm:$0xff] %v123_v0  ;;  %v137_v26 = vmul.f32 %v111_v37, %v365_v46  ;;  %v138_v28 = vmul.f32 %v111_v37, %v368_v48  ;;  %v139_v30 = vmul.f32 %v111_v37, %v371_v50 }
 0x18c   :  { %156 = vst [vmem:[#allocation2 + $0x58] sm:$0xff] %v124_v1  ;;  %157 = vst [vmem:[#allocation2 + $0x60] sm:$0xff] %v125_v2  ;;  %v140_v32 = vmul.f32 %v111_v37, %v374_v52  ;;  %v141_v34 = vmul.f32 %v111_v37, %v377_v54  ;;  %v142_v36 = vmul.f32 %v111_v37, %v380_v56 }
 0x18d   :  { %158 = vst [vmem:[#allocation2 + $0x68] sm:$0xff] %v126_v4  ;;  %159 = vst [vmem:[#allocation2 + $0x70] sm:$0xff] %v127_v6  ;;  %v143_v38 = vmul.f32 %v111_v37, %v383_v58  ;;  %v144_v40 = vmul.f32 %v111_v37, %v386_v60 }
 0x18e   :  { %160 = vst [vmem:[#allocation2 + $0x78] sm:$0xff] %v128_v8  ;;  %161 = vst [vmem:[#allocation2 + $0x80] sm:$0xff] %v129_v10 }
 0x18f   :  { %162 = vst [vmem:[#allocation2 + $0x88] sm:$0xff] %v130_v12  ;;  %163 = vst [vmem:[#allocation2 + $0x90] sm:$0xff] %v131_v14 }
 0x190   :  { %164 = vst [vmem:[#allocation2 + $0x98] sm:$0xff] %v132_v16  ;;  %165 = vst [vmem:[#allocation2 + $0xa0] sm:$0xff] %v133_v18 }
 0x191   :  { %166 = vst [vmem:[#allocation2 + $0xa8] sm:$0xff] %v134_v20  ;;  %167 = vst [vmem:[#allocation2 + $0xb0] sm:$0xff] %v135_v22 }
 0x192   :  { %168 = vst [vmem:[#allocation2 + $0xb8] sm:$0xff] %v136_v24  ;;  %169 = vst [vmem:[#allocation2 + $0xc0] sm:$0xff] %v137_v26 }
 0x193   :  { %170 = vst [vmem:[#allocation2 + $0xc8] sm:$0xff] %v138_v28  ;;  %171 = vst [vmem:[#allocation2 + $0xd0] sm:$0xff] %v139_v30 }
 0x194   :  { %172 = vst [vmem:[#allocation2 + $0xd8] sm:$0xff] %v140_v32  ;;  %173 = vst [vmem:[#allocation2 + $0xe0] sm:$0xff] %v141_v34 }
 0x195   :  { %174 = vst [vmem:[#allocation2 + $0xe8] sm:$0xff] %v142_v36  ;;  %175 = vst [vmem:[#allocation2 + $0xf0] sm:$0xff] %v143_v38 }
 0x196   :  { %176 = vst [vmem:[#allocation2 + $0xf8] sm:$0xff] %v144_v40 }
 0x197   :  { %237 = shalt.err (!%p284_p7)  }
 0x198   :  { %s238_s28 = scalar_lea.hbm %s448_s2, 4096 }
 0x199   :  { %p239_p8 = scmp.ne.s32.totalorder %s448_s2, %s238_s28  ;;  %p242_p9 = scmp.lt.u32.totalorder %s238_s28, %s448_s2 }
 0x19b   :  { %p244_p10 = pnand %p242_p9, %p239_p8 }
 0x19d   :  { %247 = shalt.err (!%p244_p10)  }
 0x19e   :  { %187 = dma.vmem_to_hbm [thread:$0]  %s269_s10, 4096, %s448_s2, [#allocation3] }
 0x19f   :  { %250 = dma.done.wait [#allocation3], 4096 }
 0x1a0   :  { %251 = vsyncadd [#allocation3], 4294963200 }
 0x1a1   :  { %190 = vsyncmov [#allocation3] }
 0x1a4   :  { %s191_s7 = vpop.sfrf %190 }
 0x1a5   :  { %p196_p11 = scmp.ne.s32.totalorder %s191_s7, 0 }
 0x1a7   :  { %195 = shalt.err (%p196_p11)  }

</bundles_post_ra>
